<compile_context>
chip_gen: v7x
topology: tpu7x:2x2x1
jax: 0.10.0
libtpu: 0.0.40
codegen_flags: <defaults>
</compile_context>

<pallas_src>
import jax
import jax.numpy as jnp
from jax.experimental import pallas as pl
from jax.experimental.pallas import tpu as pltpu


def _critic_kernel(x_ref, w1_ref, b1_ref, w2_ref, b2_ref, w3_ref, b3_ref,
                   out_ref):
    # ---- Layer 1: (TB, D) @ (D, H), bf16 operands, f32 accumulate (MXU) -----
    h1 = jnp.dot(x_ref[...], w1_ref[...], preferred_element_type=jnp.float32)
    h1 = jnp.maximum(h1 + b1_ref[...], 0.0)            # bias + ReLU in f32 (VPU)

    # ---- Layer 2: (TB, H) @ (H, H) -------------------------------------------
    h2 = jnp.dot(h1.astype(jnp.bfloat16), w2_ref[...],
                 preferred_element_type=jnp.float32)
    h2 = jnp.maximum(h2 + b2_ref[...], 0.0)

    # ---- Layer 3: contract H with w3 on the LHS -> lane-dense (1, TB) row ----
    # Avoids the (TB, 1) lane-sparse output (masked stores + 128x padded VMEM).
    v = jax.lax.dot_general(
        w3_ref[...], h2.astype(jnp.bfloat16),
        dimension_numbers=(((1,), (1,)), ((), ())),
        preferred_element_type=jnp.float32)             # (1, TB)
    out_ref[...] = v + b3_ref[...]


def _round_up(x, m):
    return ((x + m - 1) // m) * m


def critic_forward(state_list, action_list, params, *, tile_b=4096):
    """state_list/action_list: lists of (B, d_i) arrays. params: dict of weights."""
    # The wrapper already has to materialise a concat; do the full one here and
    # feed the kernel a single (B, S+A) bf16 stream (halves input DMA streams
    # and layer-1 MXU passes vs. separate state/action inputs).
    cat = jnp.concatenate(list(state_list) + list(action_list), axis=1)
    B, D = cat.shape
    H = params["w2"].shape[0]

    # --- batch tiling ----------------------------------------------------------
    if B <= 32:
        TB, nb = B, 1                           # one full-dim block, no padding
    else:
        # >= 2 grid steps so v7x's two TensorCores both get work ("parallel"
        # batch axis); equalise tile sizes to keep padding minimal; 16-row
        # granularity for bf16 sublanes.
        nb = max(2, pl.cdiv(B, tile_b))
        TB = _round_up(pl.cdiv(B, nb), 16)
        nb = pl.cdiv(B, TB)
    Bp = nb * TB

    x = cat.astype(jnp.bfloat16)
    if Bp != B:
        # At most TB-1 rows of padding (tiles are equalised so this is usually
        # small or zero); XLA fuses the pad with the concat/cast pass above.
        x = jnp.pad(x, ((0, Bp - B), (0, 0)))

    # bf16 matmul weights; biases stay f32.
    w1 = params["w1"].astype(jnp.bfloat16)               # (D, H)
    w2 = params["w2"].astype(jnp.bfloat16)               # (H, H)
    w3 = params["w3"].reshape(1, H).astype(jnp.bfloat16)  # (1, H)
    b1 = params["b1"].astype(jnp.float32)                 # (1, H)
    b2 = params["b2"].astype(jnp.float32)                 # (1, H)
    b3 = params["b3"].astype(jnp.float32)                 # (1, 1)

    flops = 2 * Bp * (D * H + H * H + H)
    bytes_accessed = (
        x.size * 2                                # bf16 activations in
        + Bp * 4                                  # f32 values out
        + (w1.size + w2.size + w3.size) * 2       # bf16 weights
        + (b1.size + b2.size + b3.size) * 4
    )

    resident = lambda i: (0, 0)                   # weights: same block every step
    out = pl.pallas_call(
        _critic_kernel,
        out_shape=jax.ShapeDtypeStruct((nb, TB), jnp.float32),   # lane-dense
        grid=(nb,),
        in_specs=[
            pl.BlockSpec((TB, D), lambda i: (i, 0)),
            pl.BlockSpec((D, H), resident),
            pl.BlockSpec((1, H), resident),
            pl.BlockSpec((H, H), resident),
            pl.BlockSpec((1, H), resident),
            pl.BlockSpec((1, H), resident),
            pl.BlockSpec((1, 1), resident),
        ],
        out_specs=pl.BlockSpec((1, TB), lambda i: (i, 0)),
        compiler_params=pltpu.CompilerParams(
            dimension_semantics=("parallel",),
            vmem_limit_bytes=32 * 1024 * 1024),   # raises v5e's 16 MiB default
        cost_estimate=pl.CostEstimate(
            flops=flops, transcendentals=0, bytes_accessed=bytes_accessed),
    )(x, w1, b1, w2, b2, w3, b3)

    # NOTE: padded rows carry nonzero values (the bias ReLU-propagates); they
    # are discarded here and must never be reduced over before this slice.
    return out.reshape(-1)[:B].reshape(B, 1)


def _orthogonal(key, out_features, in_features, std=1.0):
    # Mimic nn.init.orthogonal_(weight, std) for a (out, in) PyTorch weight,
    # then return it transposed to (in, out) for the x @ W layout.
    w = jax.nn.initializers.orthogonal(scale=std)(
        key, (out_features, in_features), jnp.float32
    )
    return w.T


def init_critic_params(key, in_dim, n_hiddens, bias_const=1e-6):
    # TODO(synk): fusing the per-agent critic heads (stacking W1/W2/W3 along the
    # output dim, e.g. H_total = n_agents * 32) is the only lever that raises
    # MXU column utilisation meaningfully, but it changes the model config.
    k1, k2, k3 = jax.random.split(key, 3)
    return {
        "w1": _orthogonal(k1, n_hiddens, in_dim),
        "b1": jnp.full((1, n_hiddens), bias_const, jnp.float32),
        "w2": _orthogonal(k2, n_hiddens, n_hiddens),
        "b2": jnp.full((1, n_hiddens), bias_const, jnp.float32),
        "w3": _orthogonal(k3, 1, n_hiddens),
        "b3": jnp.full((1, 1), bias_const, jnp.float32),
    }


if __name__ == "__main__":
    # Small synthetic MADDPG setup: 3 agents, obs dims [6,6,6], action dims [2,2,2]
    obs_shape = [6, 6, 6]
    action_shape = [2, 2, 2]
    n_hiddens = 32
    batch = 4
    in_dim = sum(obs_shape) + sum(action_shape)  # 24

    key = jax.random.PRNGKey(0)
    kp, ks, ka = jax.random.split(key, 3)

    params = init_critic_params(kp, in_dim, n_hiddens)

    state_keys = jax.random.split(ks, len(obs_shape))
    action_keys = jax.random.split(ka, len(action_shape))
    state_list = [
        jax.random.normal(state_keys[i], (batch, d), jnp.float32)
        for i, d in enumerate(obs_shape)
    ]
    action_list = [
        jax.random.normal(action_keys[i], (batch, d), jnp.float32)
        for i, d in enumerate(action_shape)
    ]

    value = critic_forward(state_list, action_list, params)
    value = jax.block_until_ready(value)

    # Pure-JAX reference with the same bf16-operand / f32-accumulate precision.
    def bf(x):
        return x.astype(jnp.bfloat16).astype(jnp.float32)

    cat = jnp.concatenate(state_list + action_list, axis=1)
    h1 = jnp.maximum(bf(cat) @ bf(params["w1"]) + params["b1"], 0.0)
    h2 = jnp.maximum(bf(h1) @ bf(params["w2"]) + params["b2"], 0.0)
    ref = bf(h2) @ bf(params["w3"]) + params["b3"]

    assert value.shape == (batch, 1)
    assert jnp.allclose(value, ref, atol=1e-2, rtol=1e-2), (value, ref)

    # Also exercise the multi-tile (nb >= 2) + ragged/padded path.
    big_state = [jnp.tile(s, (300, 1)) for s in state_list]    # B = 1200
    big_action = [jnp.tile(a, (300, 1)) for a in action_list]
    big_value = jax.block_until_ready(
        critic_forward(big_state, big_action, params))
    assert big_value.shape == (batch * 300, 1)
    assert jnp.allclose(big_value[:batch], ref, atol=1e-2, rtol=1e-2)

    print("KERNEL_OK")
</pallas_src>

<mosaic_0001>
module attributes {stable_mosaic.version = 11 : i64} {
  func.func @_critic_kernel(%arg0: i32, %arg1: memref<4x24xbf16, #tpu.memory_space<vmem>>, %arg2: memref<24x32xbf16, #tpu.memory_space<vmem>>, %arg3: memref<1x32xf32, #tpu.memory_space<vmem>>, %arg4: memref<32x32xbf16, #tpu.memory_space<vmem>>, %arg5: memref<1x32xf32, #tpu.memory_space<vmem>>, %arg6: memref<1x32xbf16, #tpu.memory_space<vmem>>, %arg7: memref<1x1xf32, #tpu.memory_space<vmem>>, %arg8: memref<1x4xf32, #tpu.memory_space<vmem>>) attributes {dimension_semantics = [#tpu.dimension_semantics<parallel>], iteration_bounds = array<i64: 1>, scalar_prefetch = 0 : i64, scratch_operands = 0 : i64, tpu.core_type = #tpu.core_type<tc>, window_params = [{transform_indices = @transform_0, window_bounds = array<i64: 4, 24>}, {pipeline_mode = #tpu.pipeline_mode<synchronous>, transform_indices = @transform_1, window_bounds = array<i64: 24, 32>}, {pipeline_mode = #tpu.pipeline_mode<synchronous>, transform_indices = @transform_2, window_bounds = array<i64: 1, 32>}, {pipeline_mode = #tpu.pipeline_mode<synchronous>, transform_indices = @transform_3, window_bounds = array<i64: 32, 32>}, {pipeline_mode = #tpu.pipeline_mode<synchronous>, transform_indices = @transform_4, window_bounds = array<i64: 1, 32>}, {pipeline_mode = #tpu.pipeline_mode<synchronous>, transform_indices = @transform_5, window_bounds = array<i64: 1, 32>}, {pipeline_mode = #tpu.pipeline_mode<synchronous>, transform_indices = @transform_6, window_bounds = array<i64: 1, 1>}, {transform_indices = @transform_7, window_bounds = array<i64: 1, 4>}]} {
    %c0 = arith.constant 0 : index
    %c0_0 = arith.constant 0 : index
    %0 = vector.load %arg1[%c0, %c0_0] : memref<4x24xbf16, #tpu.memory_space<vmem>>, vector<4x24xbf16>
    %c0_1 = arith.constant 0 : index
    %c0_2 = arith.constant 0 : index
    %1 = vector.load %arg2[%c0_1, %c0_2] : memref<24x32xbf16, #tpu.memory_space<vmem>>, vector<24x32xbf16>
    %cst = arith.constant dense<0.000000e+00> : vector<4x32xf32>
    %2 = tpu.matmul %0, %1, %cst {dimension_numbers = #tpu.dot_dimension_numbers<[1], [0], [0], [1], [0, 0, 1, 1], [], []>} : vector<4x24xbf16>, vector<24x32xbf16>, vector<4x32xf32> -> vector<4x32xf32>
    %c0_3 = arith.constant 0 : index
    %c0_4 = arith.constant 0 : index
    %3 = vector.load %arg3[%c0_3, %c0_4] : memref<1x32xf32, #tpu.memory_space<vmem>>, vector<1x32xf32>
    %4 = vector.broadcast %3 : vector<1x32xf32> to vector<4x32xf32>
    %5 = arith.addf %2, %4 : vector<4x32xf32>
    %cst_5 = arith.constant 0.000000e+00 : f32
    %6 = vector.broadcast %cst_5 : f32 to vector<4x32xf32>
    %7 = arith.maximumf %5, %6 : vector<4x32xf32>
    %8 = arith.truncf %7 : vector<4x32xf32> to vector<4x32xbf16>
    %c0_6 = arith.constant 0 : index
    %c0_7 = arith.constant 0 : index
    %9 = vector.load %arg4[%c0_6, %c0_7] : memref<32x32xbf16, #tpu.memory_space<vmem>>, vector<32x32xbf16>
    %cst_8 = arith.constant dense<0.000000e+00> : vector<4x32xf32>
    %10 = tpu.matmul %8, %9, %cst_8 {dimension_numbers = #tpu.dot_dimension_numbers<[1], [0], [0], [1], [0, 0, 1, 1], [], []>} : vector<4x32xbf16>, vector<32x32xbf16>, vector<4x32xf32> -> vector<4x32xf32>
    %c0_9 = arith.constant 0 : index
    %c0_10 = arith.constant 0 : index
    %11 = vector.load %arg5[%c0_9, %c0_10] : memref<1x32xf32, #tpu.memory_space<vmem>>, vector<1x32xf32>
    %12 = vector.broadcast %11 : vector<1x32xf32> to vector<4x32xf32>
    %13 = arith.addf %10, %12 : vector<4x32xf32>
    %cst_11 = arith.constant 0.000000e+00 : f32
    %14 = vector.broadcast %cst_11 : f32 to vector<4x32xf32>
    %15 = arith.maximumf %13, %14 : vector<4x32xf32>
    %c0_12 = arith.constant 0 : index
    %c0_13 = arith.constant 0 : index
    %16 = vector.load %arg6[%c0_12, %c0_13] : memref<1x32xbf16, #tpu.memory_space<vmem>>, vector<1x32xbf16>
    %17 = arith.truncf %15 : vector<4x32xf32> to vector<4x32xbf16>
    %cst_14 = arith.constant dense<0.000000e+00> : vector<1x4xf32>
    %18 = tpu.matmul %16, %17, %cst_14 {dimension_numbers = #tpu.dot_dimension_numbers<[1], [1], [0], [0], [0, 0, 1, 0], [], []>} : vector<1x32xbf16>, vector<4x32xbf16>, vector<1x4xf32> -> vector<1x4xf32>
    %c0_15 = arith.constant 0 : index
    %c0_16 = arith.constant 0 : index
    %19 = vector.load %arg7[%c0_15, %c0_16] : memref<1x1xf32, #tpu.memory_space<vmem>>, vector<1x1xf32>
    %20 = vector.broadcast %19 : vector<1x1xf32> to vector<1x4xf32>
    %21 = arith.addf %18, %20 : vector<1x4xf32>
    %c0_17 = arith.constant 0 : index
    %c0_18 = arith.constant 0 : index
    %22 = vector.load %arg8[%c0_17, %c0_18] : memref<1x4xf32, #tpu.memory_space<vmem>>, vector<1x4xf32>
    tpu.vector_store %arg8[%c0_17, %c0_18], %21 {strides = array<i32>} : memref<1x4xf32, #tpu.memory_space<vmem>>, vector<1x4xf32>,
    return
  }
  func.func @transform_0(%arg0: i32) -> (i32, i32) {
    %c0_i32 = arith.constant 0 : i32
    %c0_i32_0 = arith.constant 0 : i32
    return %arg0, %c0_i32 : i32, i32
  }
  func.func @transform_1(%arg0: i32) -> (i32, i32) {
    %c0_i32 = arith.constant 0 : i32
    %c0_i32_0 = arith.constant 0 : i32
    %c0_i32_1 = arith.constant 0 : i32
    return %c0_i32, %c0_i32_0 : i32, i32
  }
  func.func @transform_2(%arg0: i32) -> (i32, i32) {
    %c0_i32 = arith.constant 0 : i32
    %c0_i32_0 = arith.constant 0 : i32
    %c0_i32_1 = arith.constant 0 : i32
    return %c0_i32, %c0_i32_0 : i32, i32
  }
  func.func @transform_3(%arg0: i32) -> (i32, i32) {
    %c0_i32 = arith.constant 0 : i32
    %c0_i32_0 = arith.constant 0 : i32
    %c0_i32_1 = arith.constant 0 : i32
    return %c0_i32, %c0_i32_0 : i32, i32
  }
  func.func @transform_4(%arg0: i32) -> (i32, i32) {
    %c0_i32 = arith.constant 0 : i32
    %c0_i32_0 = arith.constant 0 : i32
    %c0_i32_1 = arith.constant 0 : i32
    return %c0_i32, %c0_i32_0 : i32, i32
  }
  func.func @transform_5(%arg0: i32) -> (i32, i32) {
    %c0_i32 = arith.constant 0 : i32
    %c0_i32_0 = arith.constant 0 : i32
    %c0_i32_1 = arith.constant 0 : i32
    return %c0_i32, %c0_i32_0 : i32, i32
  }
  func.func @transform_6(%arg0: i32) -> (i32, i32) {
    %c0_i32 = arith.constant 0 : i32
    %c0_i32_0 = arith.constant 0 : i32
    %c0_i32_1 = arith.constant 0 : i32
    return %c0_i32, %c0_i32_0 : i32, i32
  }
  func.func @transform_7(%arg0: i32) -> (i32, i32) {
    %c0_i32 = arith.constant 0 : i32
    %c0_i32_0 = arith.constant 0 : i32
    return %arg0, %c0_i32 : i32, i32
  }
}

</mosaic_0001>

<bundles_post_ra>
// kernel: tpu_custom_call.1
= control target key start
LH: loop header
LB: loop body
LE: loop exit
PB: predicated region body
PF: predicated region fallthrough
CT: control target
= control target key end

     0   :  { %s498_s0 = inlined_call_operand.vmem [shape: bf16[4,24], index: 0, kind: input, shape index: {}]   ;;  %s499_s1 = inlined_call_operand.hbm [shape: bf16[24,32], index: 1, kind: input, shape index: {}]   ;;  %s500_s2 = inlined_call_operand.vmem [shape: f32[1,32], index: 2, kind: input, shape index: {}]   ;;  %s501_s3 = inlined_call_operand.hbm [shape: bf16[32,32], index: 3, kind: input, shape index: {}]   ;;  %s502_s4 = inlined_call_operand.vmem [shape: f32[1,32], index: 4, kind: input, shape index: {}]   ;;  %s503_s5 = inlined_call_operand.vmem [shape: bf16[1,32], index: 5, kind: input, shape index: {}]   ;;  %s504_s6 = inlined_call_operand.<no memory space> [shape: f32[1,1], index: 6, kind: input, shape index: {}]   ;;  %s505_s7 = inlined_call_operand.hbm [shape: f32[1,4], index: 7, kind: output, shape index: {}]  }
   0x1   :  { %v12_v0 = vstv %s504_s6 }
   0x2   :  { %13 = vst [vmem:[#allocation2] sm:$0x1] %v12_v0 }
   0x3   :  { %14 = vsyncpa [#allocation4], 0 }
   0x4   :  { %15 = vsyncpa [#allocation7], 0 }
   0x5   :  { %16 = vsyncpa [#allocation5], 0  ;;  %s396_s26 = smov [#allocation3]   ;;  %s324_s30 = scalar_lea.hbm %s499_s1, 192 }
   0x6   :  { %s24_s27 = sshll.u32 %s396_s26, 4  ;;  %p325_p0 = scmp.ne.s32.totalorder %s499_s1, %s324_s30  ;;  %s25_s27 = int_to_ptr.vmem [resolvable:$true] %s24_s27 }
   0x7   :  { %p328_p1 = scmp.lt.u32.totalorder %s324_s30, %s499_s1 }
   0x9   :  { %p330_p2 = pnand %p328_p1, %p325_p0 }
   0xb   :  { %333 = shalt.err (!%p330_p2)
}
   0xc   :  { %s334_s6 = scalar_lea.vmem %s25_s27, 192  ;;  %p339_p4 = scmp.lt.s32.totalorder %s25_s27, %s25_s27 }
   0xd   :  { %p335_p3 = scmp.ne.s32.totalorder %s25_s27, %s334_s6  ;;  %p340_p5 = scmp.lt.s32.totalorder %s334_s6, %s334_s6 }
   0xf   :  { %p341_p6 = por %p340_p5, %p339_p4 }
  0x11   :  { %p342_p7 = pnand %p341_p6, %p335_p3 }
  0x13   :  { %345 = shalt.err (!%p342_p7)
}
  0x14   :  { %s397_s12 = smov 64   ;;  %s398_s13 = smov 4  }
  0x15   :  { %30 = dma.hbm_to_vmem [thread:$0]  %s499_s1, 192, %s25_s27, [#allocation4], %s397_s12, %s397_s12, %s398_s13  }
  0x16   :  { %s399_s16 = smov [#allocation6]   ;;  %s346_s20 = scalar_lea.hbm %s501_s3, 256 }
  0x17   :  { %s38_s17 = sshll.u32 %s399_s16, 4  ;;  %p347_p8 = scmp.ne.s32.totalorder %s501_s3, %s346_s20  ;;  %s39_s17 = int_to_ptr.vmem [resolvable:$true] %s38_s17 }
  0x18   :  { %p350_p9 = scmp.lt.u32.totalorder %s346_s20, %s501_s3 }
  0x1a   :  { %p352_p10 = pnand %p350_p9, %p347_p8 }
  0x1c   :  { %355 = shalt.err (!%p352_p10)
}
  0x1d   :  { %s356_s25 = scalar_lea.vmem %s39_s17, 256  ;;  %p361_p12 = scmp.lt.s32.totalorder %s39_s17, %s39_s17 }
  0x1e   :  { %p357_p11 = scmp.ne.s32.totalorder %s39_s17, %s356_s25  ;;  %p362_p13 = scmp.lt.s32.totalorder %s356_s25, %s356_s25 }
  0x20   :  { %p363_p0 = por %p362_p13, %p361_p12 }
  0x22   :  { %p364_p1 = pnand %p363_p0, %p357_p11 }
  0x24   :  { %367 = shalt.err (!%p364_p1)
}
  0x25   :  { %44 = dma.hbm_to_vmem [thread:$0]  %s501_s3, 256, %s39_s17, [#allocation7], %s397_s12, %s397_s12, %s398_s13  }
  0x26   :  { %390 = dma.done.wait [#allocation4], 192  }
  0x27   :  { %391 = vsyncadd [#allocation4], 4294967104 }
  0x28   :  { %392 = dma.done.wait [#allocation7], 256  }
  0x29   :  { %393 = vsyncadd [#allocation7], 4294967040  ;;  %v400_v1 = vmov 0.0   ;;  %vm401_vm0 = vmmov 0   ;;  %v320_v2 = vld [vmem:[#allocation3] sm:$0xff]   ;;  %vm82_vm1 = vcmask 1043456   ;;  %v204_v28 = vlaneseq }
  0x2a   :  { %289 = vmatprep.subr.bf16.mxu0 %v400_v1  ;;  %293 = vmatprep.mubr.msk.bf16.mxu0 %vm401_vm0, %v400_v1  ;;  %v321_v3 = vld [vmem:[#allocation3 + $0x8] ss:$0 sps:$4 sm:$0xff]   ;;  %v58_v5 = vld [vmem:[%s498_s0] sm:$0x3]  ;;  %vm78_vm2 = vcmask 195584   ;;  %v322_v6 = vld [vmem:[#allocation6] sm:$0xff]  }
  0x2b   :  { %297 = vmatprep.subr.bf16.mxu1 %v400_v1  ;;  %301 = vmatprep.mubr.msk.bf16.mxu1 %vm401_vm0, %v400_v1  ;;  %v84_v4 = vsel %vm82_vm1, %v321_v3, 0  ;;  %v323_v7 = vld [vmem:[#allocation6 + $0x8] sm:$0xff]   ;;  %v272_v8 = vld [vmem:[%s500_s2] ss:$0 sm:$0xff]  ;;  %vm151_vm3 = vcmask 261120   ;;  %v402_v17 = vmov 0  }
  0x2c   :  { %290 = vmatpush3.bf16.msra.mxu0 %v320_v2  ;;  %298 = vmatpush3.bf16.msra.mxu1 %v322_v6  ;;  %v198_v16 = vld [vmem:[#allocation2] sm:$0x1]  ;;  %v205_v29 = vshrl.u32 %v204_v28, 7  ;;  %vm254_vm4 = vcmask 24576  }
  0x2d   :  { %291 = vmatprep.subr.bf16.mxu0 %v400_v1  ;;  %299 = vmatprep.subr.bf16.mxu1 %v400_v1  ;;  %v276_v18 = vld [vmem:[%s502_s4] ss:$0 sm:$0xff]  ;;  %s403_s4 = smov [#allocation8]  }
  0x2e   :  { %319 = vset.pattern.permute.xlu0 %v402_v17  ;;  %v196_v27 = vld [vmem:[%s503_s5] sm:$0x1]  ;;  %v206_v30 = vsub.s32 0, %v205_v29  ;;  %s262_s9 = sshll.u32 %s403_s4, 4  ;;  %s263_s9 = int_to_ptr.vmem [resolvable:$true] %s262_s9 }
  0x2f   :  { %201 = vperm.xlu0 %319, %v198_v16   ;;  %s368_s10 = scalar_lea.vmem %s263_s9, 16  ;;  %s372_s5 = scalar_lea.vmem %s263_s9, 32 }
  0x30   :  { %292 = vmatpush3.bf16.msra.mxu0 %v84_v4  ;;  %300 = vmatpush3.bf16.msra.mxu1 %v323_v7  ;;  %p369_p2 = scmp.ne.s32.totalorder %s263_s9, %s368_s10  ;;  %p373_p3 = scmp.lt.s32.totalorder %s263_s9, %s263_s9 }
  0x31   :  { %305 = vmatprep.subr.bf16.mxu0 %v400_v1  ;;  %p374_p4 = scmp.lt.s32.totalorder %s372_s5, %s368_s10 }
  0x33   :  { %294 = vmatmul.mubr.msk.bf16.vlgmr.msra.gmra.mrb[0].mxu0 %vm78_vm2, %v58_v5  ;;  %p375_p5 = por %p374_p4, %p373_p3 }
  0x34   :  { %307 = vmatprep.mubr.msk.bf16.mxu0 %vm401_vm0, %v400_v1 }
  0x35   :  { %p376_p6 = pnand %p375_p5, %p369_p2 }
  0xae   :  { %v202_v31 = vpop.permute.xlu0 %201 }
  0xaf   :  { %v207_v32 = vrot.slane %v202_v31, %v206_v30 }
 0x106   :  { %v120_v9 = vpop.f32.mrb[0].mxu0 }
 0x107   :  { %v121_v10 = vadd.f32 %v272_v8, %v120_v9  ;;  %v295_v11 = vpop.f32.mrb[1].mxu0 }
 0x108   :  { %v123_v12 = vpop.f32.mrb[2].mxu0 }
 0x109   :  { %v126_v13 = vmax.f32 %v121_v10, 0.0  ;;  %v296_v14 = vpop.f32.mrb[3].mxu0 }
 0x10b   :  { %v127_v15 = vpack.c.bf16 %v126_v13, %v126_v13 }
 0x10d   :  { %302 = vmatmul.mubr.msk.bf16.vlgmr.msra.gmra.mrb[0].mxu1 %vm151_vm3, %v127_v15 }
 0x1e0   :  { %v189_v19 = vpop.f32.mrb[0].mxu1 }
 0x1e1   :  { %v190_v20 = vadd.f32 %v276_v18, %v189_v19  ;;  %v303_v21 = vpop.f32.mrb[1].mxu1 }
 0x1e2   :  { %v192_v22 = vpop.f32.mrb[2].mxu1 }
 0x1e3   :  { %v195_v23 = vmax.f32 %v190_v20, 0.0  ;;  %v304_v24 = vpop.f32.mrb[3].mxu1 }
 0x1e5   :  { %v197_v25 = vpack.c.bf16 %v195_v23, %v195_v23 }
 0x1e7   :  { %v212_v26 = vsel %vm151_vm3, %v197_v25, 0 }
 0x1e8   :  { %306 = vmatpush3.bf16.xpose.msra.mxu0 %v212_v26 }
 0x1ef   :  { %308 = vmatmul.mubr.msk.bf16.vlgmr.msra.gmra.mrb[4].mxu0 %vm151_vm3, %v196_v27 }
 0x2c2   :  { %v248_v33 = vpop.f32.mrb[4].mxu0 }
 0x2c3   :  { %v249_v34 = vadd.f32 %v248_v33, %v207_v32  ;;  %v309_v35 = vpop.f32.mrb[5].mxu0 }
 0x2c4   :  { %v251_v36 = vpop.f32.mrb[6].mxu0 }
 0x2c5   :  { %v310_v37 = vpop.f32.mrb[7].mxu0  ;;  %255 = vst.msk [vmem:[#allocation8] sm:$0x1] %vm254_vm4, %v249_v34 }
 0x2c6   :  { %379 = shalt.err (!%p376_p6)
}
 0x2c7   :  { %s380_s12 = scalar_lea.hbm %s505_s7, 16 }
 0x2c8   :  { %p381_p7 = scmp.ne.s32.totalorder %s505_s7, %s380_s12  ;;  %p384_p8 = scmp.lt.u32.totalorder %s380_s12, %s505_s7 }
 0x2ca   :  { %p386_p9 = pnand %p384_p8, %p381_p7 }
 0x2cc   :  { %389 = shalt.err (!%p386_p9)
}
 0x2cd   :  { %265 = dma.vmem_to_hbm [thread:$0]  %s263_s9, 16, %s505_s7, [#allocation5]  }
 0x2ce   :  { %394 = dma.done.wait [#allocation5], 16  }
 0x2cf   :  { %395 = vsyncadd [#allocation5], 4294967280 }
 0x2d0   :  { %269 = vsyncpa [#allocation4], 1 }
 0x2d1   :  { %270 = vsyncpa [#allocation7], 1 }
 0x2d2   :  { %271 = vsyncpa [#allocation5], 1 }

</bundles_post_ra>
